<compile_context>
chip_gen: v6e
topology: v6e:2x2x1
jax: 0.10.0
libtpu: 0.0.40
codegen_flags: <defaults>
</compile_context>

<pallas_src>
import functools

import jax
import jax.numpy as jnp
from jax.experimental import pallas as pl
from jax.experimental.pallas import tpu as pltpu


_VMEM_LIMIT = 32 * 1024 * 1024  # explicit scoped-VMEM budget (safe on v5e/v6e/v7x)


# --------------------------------------------------------------------------- #
# Pass 1: global BatchNorm statistics -> per-feature scale / shift rows.
# --------------------------------------------------------------------------- #
def _bn_stats_kernel(gamma_ref, beta_ref, y_ref, scale_ref, shift_ref,
                     sum_sc, sq_sc, *, inv_batch, bn_eps):
    i = pl.program_id(0)

    @pl.when(i == 0)
    def _():
        sum_sc[...] = jnp.zeros_like(sum_sc)
        sq_sc[...] = jnp.zeros_like(sq_sc)

    y = y_ref[...]                                            # (TB, D) f32
    sum_sc[...] += jnp.sum(y, axis=0, keepdims=True)
    sq_sc[...] += jnp.sum(y * y, axis=0, keepdims=True)

    @pl.when(i == pl.num_programs(0) - 1)
    def _():
        mean = sum_sc[...] * inv_batch
        var = sq_sc[...] * inv_batch - mean * mean            # biased (training-mode BN)
        scale = gamma_ref[...] * jax.lax.rsqrt(var + bn_eps)
        scale_ref[...] = scale
        shift_ref[...] = beta_ref[...] - mean * scale


# --------------------------------------------------------------------------- #
# Pass 2: BN-apply -> fused encoder matmul -> reparameterize (k samples) -> decode.
# --------------------------------------------------------------------------- #
def _iwae_fwd_kernel(scale_ref, shift_ref, w_enc_ref, b_enc_ref, w_dec_ref, b_dec_ref,
                     y_ref, eps_ref,
                     mu_ref, logvar_ref, z_ref, recon_ref,
                     mu_sc, lv_sc, std_sc):
    j = pl.program_id(1)                                      # importance-sample index

    @pl.when(j == 0)
    def _():
        # BatchNorm apply (global stats precomputed): y_n = y*scale + shift
        y_n = y_ref[...] * scale_ref[...] + shift_ref[...]    # (TB, D) f32
        # One wide encoder matmul: (TB, D) @ (D, 2L)  [bf16 in, f32 accumulate]
        enc = jnp.dot(y_n.astype(jnp.bfloat16), w_enc_ref[...],
                      preferred_element_type=jnp.float32) + b_enc_ref[...]
        lat = mu_sc.shape[-1]
        mu = enc[:, :lat]
        lv = enc[:, lat:]
        mu_sc[...] = mu
        lv_sc[...] = lv
        std_sc[...] = jnp.exp(0.5 * lv)

    mu = mu_sc[...]
    lv = lv_sc[...]
    z = mu + eps_ref[...] * std_sc[...]                       # (TB, L) f32

    # decode_mu: (TB, L) @ (L, D)  [bf16 in, f32 accumulate]
    recon = jnp.dot(z.astype(jnp.bfloat16), w_dec_ref[...],
                    preferred_element_type=jnp.float32) + b_dec_ref[...]

    mu_ref[...] = mu
    logvar_ref[...] = lv
    z_ref[...] = z
    recon_ref[...] = recon


# --------------------------------------------------------------------------- #
# Wrapper
# --------------------------------------------------------------------------- #
def _pick_batch_tile(batch, max_tile=512):
    if batch <= max_tile:
        return batch
    for t in range(max_tile, 7, -8):
        if batch % t == 0:
            return t
    return batch


def iwae_forward(params, y, eps, k=1, x=None, tile_b=None):
    """Fused IWAE.forward.

    y:   (B, D) float32
    eps: (k, B, L) float32 standard-normal noise (torch.randn_like equivalent)
    Returns (mu_ups, logvar_ups, z, recon_y) in PyTorch layout:
      k == 1 -> (B, L), (B, L), (B, L), (B, D)
      k >  1 -> (B, k, L), (B, k, L), (B, k, L), (B, k, D)
    `x` (confounders) is unused by IWAE.forward and ignored.
    """
    del x
    B, D = y.shape
    L = params["w_mu"].shape[1]
    assert eps.shape == (k, B, L), eps.shape

    tb = tile_b if tile_b is not None else _pick_batch_tile(B)
    assert B % tb == 0 and (tb == B or tb % 8 == 0), (B, tb)
    nb = B // tb

    gamma = params["gamma"].astype(jnp.float32)
    beta = params["beta"].astype(jnp.float32)
    # Fused encoder weight/bias (one wide MXU call); weights stored bf16 (halves DMA).
    w_enc = jnp.concatenate([params["w_mu"], params["w_logvar"]], axis=1).astype(jnp.bfloat16)
    b_enc = jnp.concatenate([params["b_mu"], params["b_logvar"]], axis=1).astype(jnp.float32)
    w_dec = params["w_dec"].astype(jnp.bfloat16)
    b_dec = params["b_dec"].astype(jnp.float32)

    # ---- Pass 1: global BN stats -> (1, D) scale/shift rows ----
    scale, shift = pl.pallas_call(
        functools.partial(_bn_stats_kernel, inv_batch=1.0 / B, bn_eps=1e-5),
        grid=(nb,),
        in_specs=[
            pl.BlockSpec((1, D), lambda i: (0, 0)),            # gamma
            pl.BlockSpec((1, D), lambda i: (0, 0)),            # beta
            pl.BlockSpec((tb, D), lambda i: (i, 0)),           # y tile
        ],
        out_specs=(
            pl.BlockSpec((1, D), lambda i: (0, 0)),            # scale (resident)
            pl.BlockSpec((1, D), lambda i: (0, 0)),            # shift (resident)
        ),
        out_shape=(
            jax.ShapeDtypeStruct((1, D), jnp.float32),
            jax.ShapeDtypeStruct((1, D), jnp.float32),
        ),
        scratch_shapes=[pltpu.VMEM((1, D), jnp.float32),
                        pltpu.VMEM((1, D), jnp.float32)],
        compiler_params=pltpu.CompilerParams(
            dimension_semantics=("arbitrary",),
            vmem_limit_bytes=_VMEM_LIMIT),
    )(gamma, beta, y)

    # ---- Pass 2: fused encode / reparameterize / decode over (batch tiles, k) ----
    mu_k, lv_k, z_k, recon_k = pl.pallas_call(
        _iwae_fwd_kernel,
        grid=(nb, k),
        in_specs=[
            pl.BlockSpec((1, D), lambda i, j: (0, 0)),                 # scale
            pl.BlockSpec((1, D), lambda i, j: (0, 0)),                 # shift
            pl.BlockSpec((D, 2 * L), lambda i, j: (0, 0)),             # w_enc (bf16)
            pl.BlockSpec((1, 2 * L), lambda i, j: (0, 0)),             # b_enc
            pl.BlockSpec((L, D), lambda i, j: (0, 0)),                 # w_dec (bf16)
            pl.BlockSpec((1, D), lambda i, j: (0, 0)),                 # b_dec
            pl.BlockSpec((tb, D), lambda i, j: (i, 0)),                # y tile
            pl.BlockSpec((None, tb, L), lambda i, j: (j, i, 0)),       # eps (k, B, L)
        ],
        out_specs=(
            pl.BlockSpec((None, tb, L), lambda i, j: (j, i, 0)),       # mu_ups
            pl.BlockSpec((None, tb, L), lambda i, j: (j, i, 0)),       # logvar_ups
            pl.BlockSpec((None, tb, L), lambda i, j: (j, i, 0)),       # z
            pl.BlockSpec((None, tb, D), lambda i, j: (j, i, 0)),       # recon_y
        ),
        out_shape=(
            jax.ShapeDtypeStruct((k, B, L), jnp.float32),
            jax.ShapeDtypeStruct((k, B, L), jnp.float32),
            jax.ShapeDtypeStruct((k, B, L), jnp.float32),
            jax.ShapeDtypeStruct((k, B, D), jnp.float32),
        ),
        scratch_shapes=[pltpu.VMEM((tb, L), jnp.float32),    # mu
                        pltpu.VMEM((tb, L), jnp.float32),    # logvar
                        pltpu.VMEM((tb, L), jnp.float32)],   # std
        compiler_params=pltpu.CompilerParams(
            dimension_semantics=("parallel", "arbitrary"),
            vmem_limit_bytes=_VMEM_LIMIT),
    )(scale, shift, w_enc, b_enc, w_dec, b_dec, y, eps)

    if k == 1:
        # PyTorch squeezes the singleton importance-sample dim.
        return mu_k[0], lv_k[0], z_k[0], recon_k[0]
    perm = (1, 0, 2)
    return (jnp.transpose(mu_k, perm), jnp.transpose(lv_k, perm),
            jnp.transpose(z_k, perm), jnp.transpose(recon_k, perm))


def init_params(key, input_dim, latent_dim):
    """Parameter init mirroring IWAE.__init__ shapes (Linear weights stored as (in, out))."""
    ks = jax.random.split(key, 6)

    def lin(kw, kb, fan_in, fan_out):
        bound = 1.0 / (float(fan_in) ** 0.5)
        w = jax.random.uniform(kw, (fan_in, fan_out), jnp.float32, -bound, bound)
        b = jax.random.uniform(kb, (1, fan_out), jnp.float32, -bound, bound)
        return w, b

    w_mu, b_mu = lin(ks[0], ks[1], input_dim, latent_dim)
    w_lv, b_lv = lin(ks[2], ks[3], input_dim, latent_dim)
    w_dec, b_dec = lin(ks[4], ks[5], latent_dim, input_dim)

    return {
        "gamma": jnp.ones((1, input_dim), jnp.float32),    # encnorm weight
        "beta": jnp.zeros((1, input_dim), jnp.float32),    # encnorm bias
        "w_mu": w_mu, "b_mu": b_mu,
        "w_logvar": w_lv, "b_logvar": b_lv,
        "w_dec": w_dec, "b_dec": b_dec,
        # decnorm / decode_logvar exist on the module but are unused in forward().
        "decode_logvar": jnp.zeros((1,), jnp.float32),
    }


if __name__ == "__main__":
    B, INPUT_DIM, LATENT_DIM, K = 64, 256, 128, 4   # small, TPU-tile aligned

    key = jax.random.PRNGKey(0)
    k_y, k_eps, k_par = jax.random.split(key, 3)

    y = jax.random.normal(k_y, (B, INPUT_DIM), jnp.float32)
    eps = jax.random.normal(k_eps, (K, B, LATENT_DIM), jnp.float32)
    params = init_params(k_par, INPUT_DIM, LATENT_DIM)

    mu, logvar, z, recon_y = iwae_forward(params, y, eps, k=K, tile_b=32)
    jax.block_until_ready((mu, logvar, z, recon_y))

    assert mu.shape == (B, K, LATENT_DIM) and recon_y.shape == (B, K, INPUT_DIM)

    # Pure-JAX reference with the same numerics (scale/shift BN, bf16 matmul
    # operands, f32 accumulation) -- validates the fused kernel end-to-end.
    f32, bf16 = jnp.float32, jnp.bfloat16
    mean = jnp.mean(y, axis=0, keepdims=True)
    var = jnp.mean(y * y, axis=0, keepdims=True) - mean * mean
    scale_r = params["gamma"] * jax.lax.rsqrt(var + 1e-5)
    shift_r = params["beta"] - mean * scale_r
    y_n = (y * scale_r + shift_r).astype(bf16).astype(f32)
    w_mu_r = params["w_mu"].astype(bf16).astype(f32)
    w_lv_r = params["w_logvar"].astype(bf16).astype(f32)
    w_dec_r = params["w_dec"].astype(bf16).astype(f32)
    mu_r = y_n @ w_mu_r + params["b_mu"]
    lv_r = y_n @ w_lv_r + params["b_logvar"]
    std_r = jnp.exp(0.5 * lv_r)
    z_r = mu_r[None] + eps * std_r[None]                              # (K, B, L)
    recon_r = jnp.einsum("kbl,ld->kbd",
                         z_r.astype(bf16).astype(f32), w_dec_r) + params["b_dec"]

    mu_ref = jnp.broadcast_to(mu_r[:, None, :], (B, K, LATENT_DIM))
    lv_ref = jnp.broadcast_to(lv_r[:, None, :], (B, K, LATENT_DIM))
    z_ref = jnp.transpose(z_r, (1, 0, 2))
    recon_ref = jnp.transpose(recon_r, (1, 0, 2))

    assert jnp.allclose(mu, mu_ref, atol=2e-2)
    assert jnp.allclose(logvar, lv_ref, atol=2e-2)
    assert jnp.allclose(z, z_ref, atol=2e-2)
    assert jnp.allclose(recon_y, recon_ref, atol=2e-2)

    print("KERNEL_OK")
</pallas_src>

<mosaic_0001>
module attributes {stable_mosaic.version = 11 : i64} {
  func.func @_bn_stats_kernel(%arg0: i32, %arg1: memref<1x256xf32, #tpu.memory_space<vmem>>, %arg2: memref<1x256xf32, #tpu.memory_space<vmem>>, %arg3: memref<32x256xf32, #tpu.memory_space<vmem>>, %arg4: memref<1x256xf32, #tpu.memory_space<vmem>>, %arg5: memref<1x256xf32, #tpu.memory_space<vmem>>, %arg6: memref<1x256xf32, #tpu.memory_space<vmem>>, %arg7: memref<1x256xf32, #tpu.memory_space<vmem>>) attributes {dimension_semantics = [#tpu.dimension_semantics<arbitrary>], iteration_bounds = array<i64: 2>, scalar_prefetch = 0 : i64, scratch_operands = 2 : i64, tpu.core_type = #tpu.core_type<tc>, window_params = [{pipeline_mode = #tpu.pipeline_mode<synchronous>, transform_indices = @transform_0, window_bounds = array<i64: 1, 256>}, {pipeline_mode = #tpu.pipeline_mode<synchronous>, transform_indices = @transform_1, window_bounds = array<i64: 1, 256>}, {transform_indices = @transform_2, window_bounds = array<i64: 32, 256>}, {pipeline_mode = #tpu.pipeline_mode<synchronous>, transform_indices = @transform_3, window_bounds = array<i64: 1, 256>}, {pipeline_mode = #tpu.pipeline_mode<synchronous>, transform_indices = @transform_4, window_bounds = array<i64: 1, 256>}]} {
    %c0_i32 = arith.constant 0 : i32
    %0 = arith.cmpi eq, %arg0, %c0_i32 : i32
    %1 = arith.extui %0 : i1 to i32
    %c0_i32_0 = arith.constant 0 : i32
    %2 = arith.cmpi ne, %1, %c0_i32_0 : i32
    scf.if %2 {
      %cst_12 = arith.constant 0.000000e+00 : f32
      %18 = vector.broadcast %cst_12 : f32 to vector<1x256xf32>
      %c0_13 = arith.constant 0 : index
      %c0_14 = arith.constant 0 : index
      %19 = vector.load %arg6[%c0_13, %c0_14] : memref<1x256xf32, #tpu.memory_space<vmem>>, vector<1x256xf32>
      tpu.vector_store %arg6[%c0_13, %c0_14], %18 {strides = array<i32>} : memref<1x256xf32, #tpu.memory_space<vmem>>, vector<1x256xf32>,
      %cst_15 = arith.constant 0.000000e+00 : f32
      %20 = vector.broadcast %cst_15 : f32 to vector<1x256xf32>
      %c0_16 = arith.constant 0 : index
      %c0_17 = arith.constant 0 : index
      %21 = vector.load %arg7[%c0_16, %c0_17] : memref<1x256xf32, #tpu.memory_space<vmem>>, vector<1x256xf32>
      tpu.vector_store %arg7[%c0_16, %c0_17], %20 {strides = array<i32>} : memref<1x256xf32, #tpu.memory_space<vmem>>, vector<1x256xf32>,
    } else {
    }
    %c0 = arith.constant 0 : index
    %c0_1 = arith.constant 0 : index
    %3 = vector.load %arg3[%c0, %c0_1] : memref<32x256xf32, #tpu.memory_space<vmem>>, vector<32x256xf32>
    %c0_2 = arith.constant 0 : index
    %c0_3 = arith.constant 0 : index
    %4 = vector.load %arg6[%c0_2, %c0_3] : memref<1x256xf32, #tpu.memory_space<vmem>>, vector<1x256xf32>
    %cst = arith.constant dense<0.000000e+00> : vector<256xf32>
    %5 = vector.multi_reduction <add>, %3, %cst [0] : vector<32x256xf32> to vector<256xf32>
    %6 = vector.shape_cast %5 : vector<256xf32> to vector<1x256xf32>
    %7 = arith.addf %4, %6 : vector<1x256xf32>
    %c0_4 = arith.constant 0 : index
    %c0_5 = arith.constant 0 : index
    %8 = vector.load %arg6[%c0_4, %c0_5] : memref<1x256xf32, #tpu.memory_space<vmem>>, vector<1x256xf32>
    tpu.vector_store %arg6[%c0_4, %c0_5], %7 {strides = array<i32>} : memref<1x256xf32, #tpu.memory_space<vmem>>, vector<1x256xf32>,
    %c0_6 = arith.constant 0 : index
    %c0_7 = arith.constant 0 : index
    %9 = vector.load %arg7[%c0_6, %c0_7] : memref<1x256xf32, #tpu.memory_space<vmem>>, vector<1x256xf32>
    %10 = arith.mulf %3, %3 : vector<32x256xf32>
    %cst_8 = arith.constant dense<0.000000e+00> : vector<256xf32>
    %11 = vector.multi_reduction <add>, %10, %cst_8 [0] : vector<32x256xf32> to vector<256xf32>
    %12 = vector.shape_cast %11 : vector<256xf32> to vector<1x256xf32>
    %13 = arith.addf %9, %12 : vector<1x256xf32>
    %c0_9 = arith.constant 0 : index
    %c0_10 = arith.constant 0 : index
    %14 = vector.load %arg7[%c0_9, %c0_10] : memref<1x256xf32, #tpu.memory_space<vmem>>, vector<1x256xf32>
    tpu.vector_store %arg7[%c0_9, %c0_10], %13 {strides = array<i32>} : memref<1x256xf32, #tpu.memory_space<vmem>>, vector<1x256xf32>,
    %c1_i32 = arith.constant 1 : i32
    %15 = arith.cmpi eq, %arg0, %c1_i32 : i32
    %16 = arith.extui %15 : i1 to i32
    %c0_i32_11 = arith.constant 0 : i32
    %17 = arith.cmpi ne, %16, %c0_i32_11 : i32
    scf.if %17 {
      %c0_12 = arith.constant 0 : index
      %c0_13 = arith.constant 0 : index
      %18 = vector.load %arg6[%c0_12, %c0_13] : memref<1x256xf32, #tpu.memory_space<vmem>>, vector<1x256xf32>
      %cst_14 = arith.constant 1.562500e-02 : f32
      %19 = vector.broadcast %cst_14 : f32 to vector<1x256xf32>
      %20 = arith.mulf %18, %19 : vector<1x256xf32>
      %c0_15 = arith.constant 0 : index
      %c0_16 = arith.constant 0 : index
      %21 = vector.load %arg7[%c0_15, %c0_16] : memref<1x256xf32, #tpu.memory_space<vmem>>, vector<1x256xf32>
      %cst_17 = arith.constant 1.562500e-02 : f32
      %22 = vector.broadcast %cst_17 : f32 to vector<1x256xf32>
      %23 = arith.mulf %21, %22 : vector<1x256xf32>
      %24 = arith.mulf %20, %20 : vector<1x256xf32>
      %25 = arith.subf %23, %24 : vector<1x256xf32>
      %c0_18 = arith.constant 0 : index
      %c0_19 = arith.constant 0 : index
      %26 = vector.load %arg1[%c0_18, %c0_19] : memref<1x256xf32, #tpu.memory_space<vmem>>, vector<1x256xf32>
      %cst_20 = arith.constant 9.99999974E-6 : f32
      %27 = vector.broadcast %cst_20 : f32 to vector<1x256xf32>
      %28 = arith.addf %25, %27 : vector<1x256xf32>
      %29 = math.rsqrt %28 : vector<1x256xf32>
      %30 = arith.mulf %26, %29 : vector<1x256xf32>
      %c0_21 = arith.constant 0 : index
      %c0_22 = arith.constant 0 : index
      %31 = vector.load %arg4[%c0_21, %c0_22] : memref<1x256xf32, #tpu.memory_space<vmem>>, vector<1x256xf32>
      tpu.vector_store %arg4[%c0_21, %c0_22], %30 {strides = array<i32>} : memref<1x256xf32, #tpu.memory_space<vmem>>, vector<1x256xf32>,
      %c0_23 = arith.constant 0 : index
      %c0_24 = arith.constant 0 : index
      %32 = vector.load %arg2[%c0_23, %c0_24] : memref<1x256xf32, #tpu.memory_space<vmem>>, vector<1x256xf32>
      %33 = arith.mulf %20, %30 : vector<1x256xf32>
      %34 = arith.subf %32, %33 : vector<1x256xf32>
      %c0_25 = arith.constant 0 : index
      %c0_26 = arith.constant 0 : index
      %35 = vector.load %arg5[%c0_25, %c0_26] : memref<1x256xf32, #tpu.memory_space<vmem>>, vector<1x256xf32>
      tpu.vector_store %arg5[%c0_25, %c0_26], %34 {strides = array<i32>} : memref<1x256xf32, #tpu.memory_space<vmem>>, vector<1x256xf32>,
    } else {
    }
    return
  }
  func.func @transform_0(%arg0: i32) -> (i32, i32) {
    %c0_i32 = arith.constant 0 : i32
    %c0_i32_0 = arith.constant 0 : i32
    %c0_i32_1 = arith.constant 0 : i32
    return %c0_i32, %c0_i32_0 : i32, i32
  }
  func.func @transform_1(%arg0: i32) -> (i32, i32) {
    %c0_i32 = arith.constant 0 : i32
    %c0_i32_0 = arith.constant 0 : i32
    %c0_i32_1 = arith.constant 0 : i32
    return %c0_i32, %c0_i32_0 : i32, i32
  }
  func.func @transform_2(%arg0: i32) -> (i32, i32) {
    %c0_i32 = arith.constant 0 : i32
    %c0_i32_0 = arith.constant 0 : i32
    return %arg0, %c0_i32 : i32, i32
  }
  func.func @transform_3(%arg0: i32) -> (i32, i32) {
    %c0_i32 = arith.constant 0 : i32
    %c0_i32_0 = arith.constant 0 : i32
    %c0_i32_1 = arith.constant 0 : i32
    return %c0_i32, %c0_i32_0 : i32, i32
  }
  func.func @transform_4(%arg0: i32) -> (i32, i32) {
    %c0_i32 = arith.constant 0 : i32
    %c0_i32_0 = arith.constant 0 : i32
    %c0_i32_1 = arith.constant 0 : i32
    return %c0_i32, %c0_i32_0 : i32, i32
  }
}

</mosaic_0001>

<bundles_post_ra>
// kernel: tpu_custom_call.1
= control target key start
LH: loop header
LB: loop body
LE: loop exit
PB: predicated region body
PF: predicated region fallthrough
CT: control target
= control target key end

     0   :  { %10 = vsyncpa [#allocation5], 0  ;;  %s953_s0 = inlined_call_operand.hbm [shape: f32[1,256], index: 0, kind: input, shape index: {}]   ;;  %s954_s1 = inlined_call_operand.hbm [shape: f32[1,256], index: 1, kind: input, shape index: {}]   ;;  %s955_s2 = inlined_call_operand.hbm [shape: f32[64,256], index: 2, kind: input, shape index: {}]   ;;  %s956_s3 = inlined_call_operand.hbm [shape: f32[1,256], index: 3, kind: output, shape index: {0}]   ;;  %s957_s4 = inlined_call_operand.hbm [shape: f32[1,256], index: 4, kind: output, shape index: {1}]  }
   0x1   :  { %11 = vsyncpa [#allocation8], 0 }
   0x2   :  { %12 = vsyncpa [#allocation6], 0 }
   0x3   :  { %13 = vsyncpa [#allocation12], 0  ;;  %s770_s15 = smov 0   ;;  %s772_s16 = smov 0  }
   0x4   :  { %s774_s17 = smov 0   ;;  %s776_s18 = smov 0  }
   0x5 LB: > { %s789_s19 = sadd.s32 4294967295, %s734_s18   ;;  %s792_s20 = sadd.s32 1, %s734_s18   ;;  %s734_s18 = sphi %s776_s18, %s980_s18   ;;  %s730_s17 = sphi %s774_s17, %s979_s17   ;;  %s726_s16 = sphi %s772_s16, %s978_s16   ;;  %s722_s15 = sphi %s770_s15, %s977_s15  }
   0x6   : > { %s65_s21 = ssub.s32 %s734_s18, %s792_s20  ;;  %s68_s22 = sadd.s32 1, %s730_s17 }
   0x7   : > { %p66_p0 = scmp.eq.s32.totalorder %s65_s21, 0  ;;  %p75_p1 = scmp.ne.s32.totalorder %s730_s17, %s726_s16 }
   0x8   : > { %p76_p2 = scmp.eq.s32.totalorder %s734_s18, 0  ;;  %p81_p3 = scmp.ne.s32.totalorder %s726_s16, %s722_s15 }
   0x9   : > { %s802_s23 = scalar_select %p66_p0, %s730_s17, %s68_s22  }
   0xa   : > { %p804_p4 = por %p76_p2, %p75_p1  ;;  %p958_p5 = scmp.eq.s32.totalorder %s789_s19, 0 }
   0xb   : > { %p454_p6 = scmp.ge.s32.totalorder %s734_s18, 1  ;;  %p134_p7 = scmp.lt.s32.totalorder %s734_s18, 3 }
   0xc   : > { %p813_p8 = por %p958_p5, %p81_p3  ;;  %s736_s27 = smov [#allocation4]  }
   0xd   : > { %p818_p10 = pnand %p454_p6, %p134_p7  ;;  %s147_s28 = sshll.u32 %s736_s27, 4  ;;  %s148_s28 = int_to_ptr.vmem [resolvable:$true] %s147_s28 }
   0xe   : > { %s963_s25 = scalar_select %p813_p8, 1, 0 }
   0xf   : > { %s964_s26 = scalar_select %p818_p10, 1, 0 }
  0x10   : > { %p494_p11 = pneg %p818_p10  ;;  %p507_p12 = scmp.lt.s32.totalorder %s734_s18, 2 }
  0x11   : > { %s737_s30 = smov [#allocation7]   ;;  %s169_s7 = sand.u32 1, %s734_s18  }
  0x12   : > { %p827_p13 = pnand %p494_p11, %p958_p5  ;;  %s158_s5 = sshll.u32 %s737_s30, 4  ;;  %s159_s5 = int_to_ptr.vmem [resolvable:$true] %s158_s5 }
  0x13   : > { %p833_p0 = pnand %p507_p12, %p804_p4  ;;  %s567_s8 = scalar_lea.vmem %s148_s28, 32 }
  0x14   : > { %p558_p1 = pneg %p827_p13  ;;  %p568_p2 = scmp.ne.s32.totalorder %s148_s28, %s567_s8 }
  0x15   : > { %s966_s6 = scalar_select %p833_p0, 1, 0 }
  0x16   : > { %p570_p3 = pnand %p568_p2, %p558_p1  ;;  %p575_p7 = scmp.lt.s32.totalorder %s148_s28, %s148_s28 }
  0x17   : > { %p576_p11 = scmp.lt.s32.totalorder %s567_s8, %s567_s8 }
  0x18   : > { %p571_p6 = pneg %p570_p3 }
  0x19   : > { %p577_p9 = por %p576_p11, %p575_p7 }
  0x1b   : > { %p578_p5 = pnand %p577_p9, %p571_p6 }
  0x1d   : > { %581 = shalt.err (!%p578_p5)
}
  0x1e   : > { %497 = dma.hbm_to_vmem [thread:$0]  (!%p827_p13), %s953_s0, 32, %s148_s28, [#allocation5]  }
  0x1f   : > { %s593_s11 = scalar_lea.vmem %s159_s5, 32  ;;  %p601_p2 = scmp.lt.s32.totalorder %s159_s5, %s159_s5 }
  0x20   : > { %p594_p4 = scmp.ne.s32.totalorder %s159_s5, %s593_s11  ;;  %p602_p3 = scmp.lt.s32.totalorder %s593_s11, %s593_s11 }
  0x22   : > { %p596_p12 = pnand %p594_p4, %p558_p1  ;;  %p603_p10 = por %p602_p3, %p601_p2 }
  0x24   : > { %p597_p8 = pneg %p596_p12 }
  0x26   : > { %p604_p0 = pnand %p603_p10, %p597_p8 }
  0x28   : > { %607 = shalt.err (!%p604_p0)
}
  0x29   : > { %500 = dma.hbm_to_vmem [thread:$0]  (!%p827_p13), %s954_s1, 32, %s159_s5, [#allocation8]  }
  0x2a   : > { %s171_s14 = sand.u32 1, %s730_s17   ;;  %s475_s15 = sshll.u32 %s734_s18, 10 }
  0x2b   : > { %s458_s21 = sshll.u32 %s171_s14, 6  ;;  %s861_s27 = scalar_lea.hbm %s955_s2, %s475_s15 }
  0x2c   : > { %s173_s28 = scalar_lea.vmem [#allocation9], %s458_s21  ;;  %s865_s30 = scalar_lea.sflag [#allocation5], %s169_s7 }
  0x2d   : > { %s181_s29 = sshll.u32 %s173_s28, 4  ;;  %s608_s8 = scalar_lea.hbm %s861_s27, 1024  ;;  %s863_s29 = int_to_ptr.vmem [resolvable:$true] %s181_s29 }
  0x2e   : > { %p609_p5 = scmp.ne.s32.totalorder %s861_s27, %s608_s8  ;;  %p967_p8 = scmp.ne.s32.totalorder %s966_s6, 0 }
  0x2f   : > { %s613_s9 = scalar_lea.hbm %s955_s2, 2048  ;;  %p614_p0 = scmp.lt.s32.totalorder %s861_s27, %s955_s2 }
  0x30   : > { %p610_p9 = pneg %p967_p8  ;;  %p615_p1 = scmp.lt.s32.totalorder %s613_s9, %s608_s8 }
  0x32   : > { %p611_p10 = pnand %p610_p9, %p609_p5  ;;  %p616_p6 = por %p615_p1, %p614_p0 }
  0x34   : > { %p612_p13 = pneg %p611_p10 }
  0x36   : > { %p617_p7 = pnand %p616_p6, %p612_p13 }
  0x38   : > { %620 = shalt.err (!%p617_p7)
}
  0x39   : > { %s621_s7 = scalar_lea.vmem %s863_s29, 1024  ;;  %s738_s12 = smov [#allocation9]  }
  0x3a   : > { %p622_p11 = scmp.ne.s32.totalorder %s863_s29, %s621_s7  ;;  %s626_s13 = sshll.u32 %s738_s12, 4  ;;  %s627_s13 = int_to_ptr.vmem [resolvable:$false] %s626_s13 }
  0x3b   : > { %s628_s14 = scalar_lea.vmem %s627_s13, 2048  ;;  %p629_p2 = scmp.lt.s32.totalorder %s863_s29, %s627_s13 }
  0x3c   : > { %p624_p4 = pnand %p622_p11, %p610_p9  ;;  %p630_p3 = scmp.lt.s32.totalorder %s628_s14, %s621_s7 }
  0x3e   : > { %p625_p12 = pneg %p624_p4  ;;  %p631_p5 = por %p630_p3, %p629_p2 }
  0x40   : > { %p632_p10 = pnand %p631_p5, %p625_p12 }
  0x42   : > { %635 = shalt.err (!%p632_p10)
}
  0x43   : > { %s739_s15 = smov 256   ;;  %s740_s21 = smov 16  }
  0x44   : > { %504 = dma.hbm_to_vmem [thread:$0]  (!%p967_p8), %s861_s27, 1024, %s863_s29, %s865_s30, %s739_s15, %s739_s15, %s740_s21  }
  0x45   : > { %p968_p9 = scmp.ne.s32.totalorder %s964_s26, 0 }
  0x46   : > { %p969_p13 = scmp.eq.s32.totalorder (!%p968_p9), %s789_s19, 0 }
  0x47   : > { %193 = sbr.rel (%p968_p9) target bundleno = 190 (0xbe), region = 32 }
  0x4c   : > { %701 = dma.done.wait (%p969_p13), [#allocation5], 32   ;;  %p970_p0 = pmov %p969_p13 }
  0x4e   : > { %703 = vsyncadd (%p970_p0), [#allocation5], 4294967264  ;;  %p971_p1 = pmov %p970_p0 }
  0x4f   : > { %p972_p6 = pmov %p970_p0 }
  0x50   : > { %705 = dma.done.wait (%p971_p1), [#allocation8], 32  }
  0x51   : > { %707 = vsyncadd (%p972_p6), [#allocation8], 4294967264  ;;  %s203_s6 = sand.u32 1, %s789_s19   ;;  %s205_s22 = sand.u32 1, %s726_s16  }
  0x52   : > { %s465_s24 = sshll.u32 %s205_s22, 6  ;;  %s204_s26 = scalar_lea.sflag [#allocation5], %s203_s6 }
  0x53   : > { %s207_s27 = scalar_lea.vmem [#allocation9], %s465_s24  ;;  %p973_p8 = scmp.ne.s32.totalorder %s963_s25, 0 }
  0x55   : > { %709 = dma.done.wait (%p973_p8), %s204_s26, 1024  }
  0x56   : > { %711 = vsyncadd (%p973_p8), %s204_s26, 4294966272  ;;  %p974_p7 = scmp.ne.s32.totalorder %s789_s19, 0 }
  0x58   : > { %231 = sbr.rel (%p974_p7) target bundleno = 97 (0x61), region = 48 }
  0x5d   : > { %v232_v0 = vlaneseq  ;;  %v741_v1 = vmov 0.0  }
  0x5f   : > { %vm234_vm0 = vcmp.lt.s32.totalorder %v232_v0, 256 }
  0x60   : > { %236 = vst.msk [vmem:[#allocation2] sm:$0x3] %vm234_vm0, %v741_v1  ;;  %237 = vst.msk [vmem:[#allocation3] sm:$0x3] %vm234_vm0, %v741_v1 }
  0x61 PF: > { %v238_v2 = vld [vmem:[%s207_s27] sm:$0xff]  ;;  %v239_v3 = vld [vmem:[%s207_s27 + $0x8] sm:$0xff]  ;;  %v240_v4 = vld [vmem:[%s207_s27 + $0x10] sm:$0xff]  ;;  %v742_v34 = vmov 1966171168   ;;  %v271_v36 = vlaneseq  ;;  %p467_p11 = scmp.ne.s32.totalorder %s789_s19, 1 }
  0x62   : > { %v241_v5 = vld [vmem:[%s207_s27 + $0x18] sm:$0xff]  ;;  %v242_v6 = vld [vmem:[%s207_s27 + $0x20] sm:$0xff]  ;;  %v243_v7 = vld [vmem:[%s207_s27 + $0x28] sm:$0xff]  ;;  %v247_v8 = vadd.f32 %v240_v4, %v238_v2  ;;  %v290_v9 = vmul.f32 %v238_v2, %v238_v2  ;;  %v291_v10 = vmul.f32 %v239_v3, %v239_v3  ;;  %v292_v14 = vmul.f32 %v240_v4, %v240_v4 }
  0x63   : > { %v244_v11 = vld [vmem:[%s207_s27 + $0x30] sm:$0xff]  ;;  %v245_v12 = vld [vmem:[%s207_s27 + $0x38] sm:$0xff]  ;;  %v256_v13 = vadd.f32 %v241_v5, %v239_v3  ;;  %v293_v16 = vmul.f32 %v241_v5, %v241_v5  ;;  %v294_v17 = vmul.f32 %v242_v6, %v242_v6  ;;  %v295_v19 = vmul.f32 %v243_v7, %v243_v7 }
  0x64   : > { %v248_v15 = vadd.f32 %v247_v8, %v242_v6  ;;  %v296_v20 = vmul.f32 %v244_v11, %v244_v11  ;;  %v297_v22 = vmul.f32 %v245_v12, %v245_v12  ;;  %v298_v23 = vadd.f32 %v292_v14, %v290_v9 }
  0x65   : > { %v257_v18 = vadd.f32 %v256_v13, %v243_v7  ;;  %v307_v24 = vadd.f32 %v293_v16, %v291_v10  ;;  %v269_v35 = vunpack.c.l.s4 %v742_v34  ;;  %v272_v46 = vshrl.u32 %v271_v36, 7 }
  0x66   : > { %v249_v21 = vadd.f32 %v248_v15, %v244_v11  ;;  %v299_v27 = vadd.f32 %v298_v23, %v294_v17  ;;  %vm904_vm1 = vcmp.lt.s32.totalorder %v271_v36, 256 }
  0x67   : > { %v258_v25 = vadd.f32 %v257_v18, %v245_v12  ;;  %v308_v28 = vadd.f32 %v307_v24, %v295_v19  ;;  %v270_v45 = vunpack.c.0.s8 %v269_v35  ;;  %v246_v62 = vld [vmem:[#allocation2] sm:$0x3]  ;;  %v289_v4 = vld [vmem:[#allocation3] sm:$0x3] }
  0x68   : > { %v250_v26 = vrot.slane %v249_v21, 4  ;;  %v300_v31 = vadd.f32 %v299_v27, %v296_v20 }
  0x69   : > { %v259_v29 = vrot.slane %v258_v25, 4  ;;  %v309_v32 = vadd.f32 %v308_v28, %v297_v22  ;;  %v273_v55 = vsub.s32 %v270_v45, %v272_v46 }
  0x6a   : > { %v251_v30 = vadd.f32 %v250_v26, %v249_v21  ;;  %v301_v38 = vrot.slane %v300_v31, 4 }
  0x6b   : > { %v260_v33 = vadd.f32 %v259_v29, %v258_v25  ;;  %v310_v39 = vrot.slane %v309_v32, 4 }
  0x6c   : > { %v252_v37 = vrot.slane %v251_v30, 2  ;;  %v302_v42 = vadd.f32 %v301_v38, %v300_v31 }
  0x6d   : > { %v261_v40 = vrot.slane %v260_v33, 2  ;;  %v311_v43 = vadd.f32 %v310_v39, %v309_v32 }
  0x6e   : > { %v253_v41 = vadd.f32 %v252_v37, %v251_v30  ;;  %v303_v48 = vrot.slane %v302_v42, 2 }
  0x6f   : > { %v262_v44 = vadd.f32 %v261_v40, %v260_v33  ;;  %v312_v49 = vrot.slane %v311_v43, 2 }
  0x70   : > { %v254_v47 = vrot.slane %v253_v41, 1  ;;  %v304_v52 = vadd.f32 %v303_v48, %v302_v42 }
  0x71   : > { %v263_v50 = vrot.slane %v262_v44, 1  ;;  %v313_v53 = vadd.f32 %v312_v49, %v311_v43 }
  0x72   : > { %v255_v51 = vadd.f32 %v254_v47, %v253_v41  ;;  %v305_v56 = vrot.slane %v304_v52, 1 }
  0x73   : > { %v264_v54 = vadd.f32 %v263_v50, %v262_v44  ;;  %v314_v57 = vrot.slane %v313_v53, 1 }
  0x74   : > { %v306_v59 = vadd.f32 %v305_v56, %v304_v52 }
  0x75   : > { %v267_v58 = vcombine.low %v255_v51, %v264_v54  ;;  %v315_v60 = vadd.f32 %v314_v57, %v313_v53 }
  0x77   : > { %v274_v61 = vrot.slane %v267_v58, %v273_v55  ;;  %v318_v63 = vcombine.low %v306_v59, %v315_v60 }
  0x79   : > { %v281_v0 = vrot.slane %v274_v61, %v273_v55  ;;  %v325_v2 = vrot.slane %v318_v63, %v273_v55 }
  0x7b   : > { %v283_v3 = vadd.f32 %v281_v0, %v246_v62  ;;  %v332_v5 = vrot.slane %v325_v2, %v273_v55  ;;  %339 = sbr.rel (%p467_p11) target bundleno = 162 (0xa2), region = 52 }
  0x7d   : > { %288 = vst.msk [vmem:[#allocation2] sm:$0x3] %vm904_vm1, %v283_v3  ;;  %v334_v6 = vadd.f32 %v332_v5, %v289_v4 }
  0x7f   : > { %335 = vst.msk [vmem:[#allocation3] sm:$0x3] %vm904_vm1, %v334_v6 }
  0x80   : > { %v346_v14 = vld [vmem:[#allocation4] sm:$0x3]  ;;  %v351_v17 = vld [vmem:[#allocation7] sm:$0x3] }
  0x84   : > { %v340_v7 = vld [vmem:[#allocation2] sm:$0x3] }
  0x85   : > { %v341_v9 = vmul.f32 0.015625, %v340_v7 }
  0x86   : > { %v342_v8 = vld [vmem:[#allocation3] sm:$0x3] }
  0x87   : > { %v343_v10 = vmul.f32 0.015625, %v342_v8  ;;  %v344_v11 = vmul.f32 %v341_v9, %v341_v9 }
  0x89   : > { %v345_v12 = vsub.f32 %v343_v10, %v344_v11 }
  0x8b   : > { %v347_v13 = vadd.f32 1e-05, %v345_v12 }
  0x8d   : > { %554 = vrsqrt.f32 %v347_v13 }
  0x9a   : > { %v555_v15 = vpop.eup %554 }
  0x9b   : > { %v349_v16 = vmul.f32 %v555_v15, %v346_v14 }
  0x9d   : > { %350 = vst.msk [vmem:[#allocation10] sm:$0x3] %vm904_vm1, %v349_v16  ;;  %v352_v18 = vmul.f32 %v349_v16, %v341_v9 }
  0x9f   : > { %v353_v19 = vsub.f32 %v351_v17, %v352_v18 }
  0xa1   : > { %354 = vst.msk [vmem:[#allocation11] sm:$0x3] %vm904_vm1, %v353_v19 }
  0xa2 PF: > { %p510_p4 = scmp.eq.s32.totalorder %s789_s19, 1  ;;  %s743_s25 = smov [#allocation10]  }
  0xa3   : > { %s362_s28 = sshll.u32 %s743_s25, 4  ;;  %s744_s29 = smov [#allocation11]   ;;  %s363_s28 = int_to_ptr.vmem [resolvable:$true] %s362_s28 }
  0xa4   : > { %s373_s30 = sshll.u32 %s744_s29, 4  ;;  %s636_s8 = scalar_lea.vmem %s363_s28, 32  ;;  %s374_s30 = int_to_ptr.vmem [resolvable:$true] %s373_s30 }
  0xa5   : > { %p637_p12 = scmp.ne.s32.totalorder %s363_s28, %s636_s8  ;;  %p643_p5 = scmp.lt.s32.totalorder %s363_s28, %s363_s28 }
  0xa6   : > { %p644_p10 = scmp.lt.s32.totalorder %s636_s8, %s636_s8 }
  0xa7   : > { %p638_p2 = pnand %p637_p12, %p510_p4 }
  0xa8   : > { %p645_p9 = por %p644_p10, %p643_p5 }
  0xa9   : > { %p639_p3 = pneg %p638_p2 }
  0xab   : > { %p646_p13 = pnand %p645_p9, %p639_p3 }
  0xad   : > { %649 = shalt.err (!%p646_p13)
}
  0xae   : > { %487 = dma.vmem_to_hbm [thread:$0]  (%p510_p4), %s363_s28, 32, %s956_s3, [#allocation6]  }
  0xaf   : > { %s660_s9 = scalar_lea.vmem %s374_s30, 32  ;;  %p667_p8 = scmp.lt.s32.totalorder %s374_s30, %s374_s30 }
  0xb0   : > { %p661_p0 = scmp.ne.s32.totalorder %s374_s30, %s660_s9  ;;  %p668_p7 = scmp.lt.s32.totalorder %s660_s9, %s660_s9 }
  0xb2   : > { %p662_p1 = pnand %p661_p0, %p510_p4  ;;  %p669_p11 = por %p668_p7, %p667_p8 }
  0xb4   : > { %p663_p6 = pneg %p662_p1 }
  0xb6   : > { %p670_p12 = pnand %p669_p11, %p663_p6 }
  0xb8   : > { %673 = shalt.err (!%p670_p12)
}
  0xb9   : > { %489 = dma.vmem_to_hbm [thread:$0]  (%p510_p4), %s374_s30, 32, %s957_s4, [#allocation12]  }
  0xba   : > { %713 = dma.done.wait (%p510_p4), [#allocation6], 32  }
  0xbb   : > { %715 = vsyncadd (%p510_p4), [#allocation6], 4294967264 }
  0xbc   : > { %717 = dma.done.wait (%p510_p4), [#allocation12], 32  }
  0xbd   : > { %719 = vsyncadd (%p510_p4), [#allocation12], 4294967264 }
  0xbe PF: > { %p16_p2 = scmp.ge.s32.totalorder %s792_s20, 4   ;;  %s977_s15 = smov %s726_s16 }
  0xbf   : > { %s978_s16 = smov %s730_s17  ;;  %s979_s17 = smov %s802_s23 }
  0xc0   : > { %s980_s18 = smov %s792_s20  ;;  %18 = sbr.rel (!%p16_p2) target bundleno = 5 (0x5), region = 92 }
  0xc5   :  { %390 = vsyncpa [#allocation5], 1 }
  0xc6   :  { %392 = vsyncpa [#allocation5 + $0x1], 1 }
  0xc7   :  { %393 = vsyncpa [#allocation8], 1 }
  0xc8   :  { %394 = vsyncpa [#allocation6], 1 }
  0xc9   :  { %396 = vsyncpa [#allocation6 + $0x1], 1 }
  0xca   :  { %397 = vsyncpa [#allocation12], 1 }

</bundles_post_ra>
